<compile_context>
chip_gen: v7x
topology: tpu7x:2x2x1
jax: 0.10.0
libtpu: 0.0.40
codegen_flags: <defaults>
</compile_context>

<pallas_src>
import math

import jax
import jax.numpy as jnp
from jax.experimental import pallas as pl
from jax.experimental.pallas import tpu as pltpu


# -----------------------------------------------------------------------------
# Parameter init (deterministic, mirrors he_orthogonal_init + _standardize)
# -----------------------------------------------------------------------------
def _standardize(kernel: jnp.ndarray) -> jnp.ndarray:
    """Var(W)=1, E[W]=0 along dim=1 (2-D weight), unbiased variance."""
    eps = 1e-6
    mean = jnp.mean(kernel, axis=1, keepdims=True)
    var = jnp.var(kernel, axis=1, keepdims=True, ddof=1)
    return (kernel - mean) / jnp.sqrt(var + eps)


def he_orthogonal_init(key, out_features: int, in_features: int) -> jnp.ndarray:
    """(semi-)orthogonal matrix, standardized, scaled by sqrt(1/fan_in)."""
    a = jax.random.normal(key, (out_features, in_features), dtype=jnp.float32)
    flat = a if out_features >= in_features else a.T
    q, r = jnp.linalg.qr(flat)
    q = q * jnp.sign(jnp.diagonal(r))
    w = q if out_features >= in_features else q.T
    w = _standardize(w)
    fan_in = in_features
    return w * math.sqrt(1.0 / fan_in)


# -----------------------------------------------------------------------------
# Constants
# -----------------------------------------------------------------------------
_SCALED_SILU_FACTOR = 1.0 / 0.6
_INV_SQRT_2 = 1.0 / math.sqrt(2.0)


def _round_up(n: int, m: int) -> int:
    return ((n + m - 1) // m) * m


# -----------------------------------------------------------------------------
# Hardware-aware tiling
# -----------------------------------------------------------------------------
def _vmem_capacity_bytes() -> int:
    try:
        return int(pltpu.get_tpu_info().vmem_capacity_bytes)
    except Exception:
        pass
    try:
        kind = jax.devices()[0].device_kind.lower()
        if "v5" in kind or "v6" in kind:
            return 128 << 20
    except Exception:
        pass
    return 64 << 20  # conservative (v7x-sized) default


def _tile_params(batch: int, units: int, n_layers: int, mm_itemsize: int,
                 act_itemsize: int, weights_single_buffered: bool):
    """Pick the row tile, vmem limit, and whether we look like a 2-TC (v7x) chip."""
    vmem_cap = _vmem_capacity_bytes()
    is_v7x_like = vmem_cap <= (80 << 20)          # 64 MiB/TC => v7x
    if is_v7x_like:
        vmem_limit, tile_budget, tm_cap = 48 << 20, 36 << 20, 512
    else:                                          # 128 MiB VMEM: v5e / v6e
        vmem_limit, tile_budget, tm_cap = 100 << 20, 80 << 20, 1024

    # Sublane multiple for the activation dtype (8 for f32, 16 for bf16, ...).
    sub = max(8, 32 // max(act_itemsize, 1))

    w_bufs = 1 if weights_single_buffered else 2
    weight_bytes = w_bufs * n_layers * units * units * mm_itemsize
    # Per row of tile: x (up to 3 pipeline buffers) + out (2 buffers) in the
    # activation dtype, plus ~4 live f32 temporaries (x_f32, a, silu, h).
    per_row = (3 + 2) * units * act_itemsize + 4 * units * 4
    avail = max(tile_budget - weight_bytes, 8 * per_row)
    # TODO(synk): when resident weights overflow the budget (units >= ~1536 with
    # L >= 2 on v7x), stream weight K/N panels with an inner pltpu.emit_pipeline
    # instead of letting the row tile collapse.
    tm = min(tm_cap, avail // per_row)
    for align in (256, 128, sub):
        if tm >= align:
            tm = (tm // align) * align
            break
    tm = max(int(tm), sub)

    # Tiny batch: a single resident block, no per-step grid/DMA overhead.
    if _round_up(batch, sub) <= tm:
        return _round_up(batch, sub), vmem_limit, is_v7x_like

    # Only v7x has two TensorCores; make sure both get work, but never shrink
    # below 256 rows to do it. Single-TC v5e/v6e keep the big tile (better HBM
    # efficiency, fewer per-step overheads).
    if is_v7x_like:
        while tm > 256 and pl.cdiv(batch, tm) < 2:
            tm //= 2
    return max(sub, (tm // sub) * sub), vmem_limit, is_v7x_like


# -----------------------------------------------------------------------------
# One-time feature probe: are single-buffered (Buffered(1)) weight blocks OK?
# -----------------------------------------------------------------------------
_SINGLE_BUFFER_WEIGHTS = None


def _weights_single_buffer_supported() -> bool:
    global _SINGLE_BUFFER_WEIGHTS
    if _SINGLE_BUFFER_WEIGHTS is not None:
        return _SINGLE_BUFFER_WEIGHTS
    if not hasattr(pl, "Buffered"):
        _SINGLE_BUFFER_WEIGHTS = False
        return False

    def probe_kernel(w_ref, o_ref):
        o_ref[...] = w_ref[...] + 1.0

    try:
        probe = pl.pallas_call(
            probe_kernel,
            out_shape=jax.ShapeDtypeStruct((16, 128), jnp.float32),
            grid_spec=pltpu.PrefetchScalarGridSpec(
                num_scalar_prefetch=0,
                grid=(2,),
                in_specs=[pl.BlockSpec((8, 128), lambda i: (0, 0),
                                       pipeline_mode=pl.Buffered(1))],
                out_specs=pl.BlockSpec((8, 128), lambda i: (i, 0)),
            ),
        )
        jax.block_until_ready(probe(jnp.zeros((8, 128), jnp.float32)))
        _SINGLE_BUFFER_WEIGHTS = True
    except Exception:
        _SINGLE_BUFFER_WEIGHTS = False
    return _SINGLE_BUFFER_WEIGHTS


# -----------------------------------------------------------------------------
# Weight preparation (hoisted, loop-invariant; do once at parameter-build time)
# -----------------------------------------------------------------------------
def prepare_residual_weights(weights, *, matmul_dtype=None):
    """Transpose torch (out, in) weights to (in, out) so the hot path is x @ Wt,
    fold the ScaledSiLU 1/0.6 of layers 0..L-2 into the *next* layer's weights,
    and cast once to the MXU dtype. Folding before a bf16 cast changes rounding
    slightly vs. the unfused reference (covered by tolerance)."""
    mm_dtype = (jnp.dtype(matmul_dtype) if matmul_dtype is not None
                else jnp.dtype(weights[0].dtype))
    wts = []
    for l, w in enumerate(weights):
        wt = jnp.transpose(w)
        if l > 0:
            wt = wt * _SCALED_SILU_FACTOR
        wts.append(wt.astype(mm_dtype))
    return wts


# -----------------------------------------------------------------------------
# Pallas kernel: fused (matmul + SiLU) x n_layers + residual epilogue
# -----------------------------------------------------------------------------
def _make_kernel(n_layers: int, mm_dtype):
    mm_dtype = jnp.dtype(mm_dtype)
    h_scale = _SCALED_SILU_FACTOR * _INV_SQRT_2   # last layer's 1/0.6 fused w/ 1/sqrt(2)

    def kernel(x_ref, *refs):
        # refs = (w0t_ref, ..., w{L-1}t_ref, o_ref); weights are pre-transposed,
        # pre-scaled and pre-cast in prepare_residual_weights().
        o_ref = refs[n_layers]
        xv = x_ref[...]
        x_f32 = xv.astype(jnp.float32)            # residual stays f32
        h = xv.astype(mm_dtype)                   # MXU input dtype
        for l in range(n_layers):
            a = jnp.dot(h, refs[l][...], preferred_element_type=jnp.float32)
            # SiLU with a single-EUP sigmoid: sigmoid(a) = 0.5*tanh(0.5*a) + 0.5.
            s = a * (0.5 * jnp.tanh(0.5 * a) + 0.5)
            # Keep h in the MXU dtype between layers (halves live footprint in
            # bf16 mode); the last activation stays f32 for the epilogue.
            h = s.astype(mm_dtype) if l + 1 < n_layers else s
        o_ref[...] = (x_f32 * _INV_SQRT_2 + h * h_scale).astype(o_ref.dtype)

    return kernel


# -----------------------------------------------------------------------------
# Wrapper
# -----------------------------------------------------------------------------
def residual_layer_pallas(x: jnp.ndarray, weights, *, matmul_dtype=None,
                          prepared: bool = False) -> jnp.ndarray:
    """Fused ResidualLayer forward.

    x: (batch, units). weights: list of (units, units) in torch (out, in)
    layout, or the output of prepare_residual_weights(...) with prepared=True.

    matmul_dtype: dtype fed to the MXU. jnp.bfloat16 is recommended on v5e,
    v6e and v7x (the MXU is bf16-native on all three; the elementwise math
    stays f32 regardless, so there is no bf16-VPU concern on v5e). If x itself
    is bf16, activation I/O is streamed through HBM in bf16 as well.
    Accumulation is always f32.
    """
    batch, units = x.shape
    wts = list(weights) if prepared else prepare_residual_weights(
        weights, matmul_dtype=matmul_dtype)
    n_layers = len(wts)
    mm_dtype = jnp.dtype(wts[0].dtype)
    act_dtype = jnp.dtype(x.dtype)

    single_buf = _weights_single_buffer_supported()
    tm, vmem_limit, is_v7x = _tile_params(
        batch, units, n_layers, mm_dtype.itemsize, act_dtype.itemsize,
        weights_single_buffered=single_buf)
    grid = (pl.cdiv(batch, tm),)                  # partial tail tile is clamped

    if single_buf:
        # Constant index_map -> weights fetched once; single-buffer so they
        # don't eat 2x VMEM (matters most on v7x's 64 MiB).
        w_spec = pl.BlockSpec((units, units), lambda i: (0, 0),
                              pipeline_mode=pl.Buffered(1))
    else:
        w_spec = pl.BlockSpec((units, units), lambda i: (0, 0))

    if single_buf and is_v7x and grid[0] >= 4:
        # Slightly deeper input pipeline hides DMA issue latency at 3.2 TB/s.
        x_spec = pl.BlockSpec((tm, units), lambda i: (i, 0),
                              pipeline_mode=pl.Buffered(3))
    else:
        x_spec = pl.BlockSpec((tm, units), lambda i: (i, 0))
    out_spec = pl.BlockSpec((tm, units), lambda i: (i, 0))

    return pl.pallas_call(
        _make_kernel(n_layers, mm_dtype),
        out_shape=jax.ShapeDtypeStruct((batch, units), x.dtype),
        grid_spec=pltpu.PrefetchScalarGridSpec(
            num_scalar_prefetch=0,
            grid=grid,
            in_specs=[x_spec] + [w_spec] * n_layers,
            out_specs=out_spec,
        ),
        compiler_params=pltpu.CompilerParams(
            dimension_semantics=("parallel",),
            vmem_limit_bytes=vmem_limit,
        ),
    )(x, *wts)


# -----------------------------------------------------------------------------
# Pure-JAX reference (same math as the PyTorch module)
# -----------------------------------------------------------------------------
def residual_layer_ref(x, weights):
    h = x
    for w in weights:
        h = h @ w.T                    # torch Linear: y = x @ W.T (bias=False)
        h = jax.nn.silu(h) * _SCALED_SILU_FACTOR
    return (x + h) * _INV_SQRT_2


# -----------------------------------------------------------------------------
if __name__ == "__main__":
    key = jax.random.PRNGKey(0)
    batch, units, n_layers = 16, 128, 2

    keys = jax.random.split(key, 1 + n_layers)
    x = jax.random.normal(keys[0], (batch, units), dtype=jnp.float32)
    weights = [he_orthogonal_init(keys[1 + i], units, units) for i in range(n_layers)]
    ref = residual_layer_ref(x, weights)

    # 1) Default f32 path — strict check.
    out = jax.block_until_ready(residual_layer_pallas(x, weights))
    assert out.shape == (batch, units)
    assert jnp.allclose(out, ref, atol=1e-4, rtol=1e-4), \
        f"f32 max abs err = {jnp.max(jnp.abs(out - ref))}"

    # 2) Ragged batch — exercises the clamped partial tail block (no pad/slice).
    xr = x[:13]
    out_r = jax.block_until_ready(residual_layer_pallas(xr, weights))
    ref_r = residual_layer_ref(xr, weights)
    assert out_r.shape == (13, units)
    assert jnp.allclose(out_r, ref_r, atol=1e-4, rtol=1e-4), \
        f"ragged max abs err = {jnp.max(jnp.abs(out_r - ref_r))}"

    # 3) bf16 MXU with pre-prepared (hoisted) weights — looser tolerance.
    wts_bf16 = prepare_residual_weights(weights, matmul_dtype=jnp.bfloat16)
    out_bf16 = jax.block_until_ready(
        residual_layer_pallas(x, wts_bf16, prepared=True))
    assert jnp.allclose(out_bf16, ref, atol=3e-2, rtol=3e-2), \
        f"bf16-mxu max abs err = {jnp.max(jnp.abs(out_bf16 - ref))}"

    # 4) bf16 activation I/O (x and out streamed in bf16; internal math f32).
    x_bf16 = x.astype(jnp.bfloat16)
    out_act = jax.block_until_ready(
        residual_layer_pallas(x_bf16, weights, matmul_dtype=jnp.bfloat16))
    assert out_act.dtype == jnp.bfloat16
    err = jnp.max(jnp.abs(out_act.astype(jnp.float32) - ref))
    assert jnp.allclose(out_act.astype(jnp.float32), ref, atol=1e-1, rtol=1e-1), \
        f"bf16-io max abs err = {err}"

    print("KERNEL_OK")
</pallas_src>

<mosaic_0001>
module attributes {stable_mosaic.version = 11 : i64} {
  func.func @probe_kernel(%arg0: i32, %arg1: memref<8x128xf32, #tpu.memory_space<vmem>>, %arg2: memref<8x128xf32, #tpu.memory_space<vmem>>) attributes {dimension_semantics = [#tpu.dimension_semantics<arbitrary>], iteration_bounds = array<i64: 2>, scalar_prefetch = 0 : i64, scratch_operands = 0 : i64, tpu.core_type = #tpu.core_type<tc>, window_params = [{pipeline_mode = #tpu.pipeline_mode<synchronous>, transform_indices = @transform_0, window_bounds = array<i64: 8, 128>}, {transform_indices = @transform_1, window_bounds = array<i64: 8, 128>}]} {
    %c0 = arith.constant 0 : index
    %c0_0 = arith.constant 0 : index
    %0 = vector.load %arg1[%c0, %c0_0] : memref<8x128xf32, #tpu.memory_space<vmem>>, vector<8x128xf32>
    %cst = arith.constant 1.000000e+00 : f32
    %1 = vector.broadcast %cst : f32 to vector<8x128xf32>
    %2 = arith.addf %0, %1 : vector<8x128xf32>
    %c0_1 = arith.constant 0 : index
    %c0_2 = arith.constant 0 : index
    %3 = vector.load %arg2[%c0_1, %c0_2] : memref<8x128xf32, #tpu.memory_space<vmem>>, vector<8x128xf32>
    tpu.vector_store %arg2[%c0_1, %c0_2], %2 {strides = array<i32>} : memref<8x128xf32, #tpu.memory_space<vmem>>, vector<8x128xf32>,
    return
  }
  func.func @transform_0(%arg0: i32) -> (i32, i32) {
    %c0_i32 = arith.constant 0 : i32
    %c0_i32_0 = arith.constant 0 : i32
    %c0_i32_1 = arith.constant 0 : i32
    return %c0_i32, %c0_i32_0 : i32, i32
  }
  func.func @transform_1(%arg0: i32) -> (i32, i32) {
    %c0_i32 = arith.constant 0 : i32
    %c0_i32_0 = arith.constant 0 : i32
    return %arg0, %c0_i32 : i32, i32
  }
}

module attributes {stable_mosaic.version = 11 : i64} {
  func.func @kernel(%arg0: i32, %arg1: memref<16x128xf32, #tpu.memory_space<vmem>>, %arg2: memref<128x128xf32, #tpu.memory_space<vmem>>, %arg3: memref<128x128xf32, #tpu.memory_space<vmem>>, %arg4: memref<16x128xf32, #tpu.memory_space<vmem>>) attributes {dimension_semantics = [#tpu.dimension_semantics<parallel>], iteration_bounds = array<i64: 1>, scalar_prefetch = 0 : i64, scratch_operands = 0 : i64, tpu.core_type = #tpu.core_type<tc>, window_params = [{transform_indices = @transform_0, window_bounds = array<i64: 16, 128>}, {pipeline_mode = #tpu.pipeline_mode<synchronous>, transform_indices = @transform_1, window_bounds = array<i64: 128, 128>}, {pipeline_mode = #tpu.pipeline_mode<synchronous>, transform_indices = @transform_2, window_bounds = array<i64: 128, 128>}, {transform_indices = @transform_3, window_bounds = array<i64: 16, 128>}]} {
    %c0 = arith.constant 0 : index
    %c0_0 = arith.constant 0 : index
    %0 = vector.load %arg1[%c0, %c0_0] : memref<16x128xf32, #tpu.memory_space<vmem>>, vector<16x128xf32>
    %c0_1 = arith.constant 0 : index
    %c0_2 = arith.constant 0 : index
    %1 = vector.load %arg2[%c0_1, %c0_2] : memref<128x128xf32, #tpu.memory_space<vmem>>, vector<128x128xf32>
    %cst = arith.constant dense<0.000000e+00> : vector<16x128xf32>
    %2 = tpu.matmul %0, %1, %cst {dimension_numbers = #tpu.dot_dimension_numbers<[1], [0], [0], [1], [0, 0, 1, 1], [], []>} : vector<16x128xf32>, vector<128x128xf32>, vector<16x128xf32> -> vector<16x128xf32>
    %cst_3 = arith.constant 5.000000e-01 : f32
    %3 = vector.broadcast %cst_3 : f32 to vector<16x128xf32>
    %4 = arith.mulf %3, %2 : vector<16x128xf32>
    %5 = math.tanh %4 : vector<16x128xf32>
    %cst_4 = arith.constant 5.000000e-01 : f32
    %6 = vector.broadcast %cst_4 : f32 to vector<16x128xf32>
    %7 = arith.mulf %6, %5 : vector<16x128xf32>
    %cst_5 = arith.constant 5.000000e-01 : f32
    %8 = vector.broadcast %cst_5 : f32 to vector<16x128xf32>
    %9 = arith.addf %7, %8 : vector<16x128xf32>
    %10 = arith.mulf %2, %9 : vector<16x128xf32>
    %c0_6 = arith.constant 0 : index
    %c0_7 = arith.constant 0 : index
    %11 = vector.load %arg3[%c0_6, %c0_7] : memref<128x128xf32, #tpu.memory_space<vmem>>, vector<128x128xf32>
    %cst_8 = arith.constant dense<0.000000e+00> : vector<16x128xf32>
    %12 = tpu.matmul %10, %11, %cst_8 {dimension_numbers = #tpu.dot_dimension_numbers<[1], [0], [0], [1], [0, 0, 1, 1], [], []>} : vector<16x128xf32>, vector<128x128xf32>, vector<16x128xf32> -> vector<16x128xf32>
    %cst_9 = arith.constant 5.000000e-01 : f32
    %13 = vector.broadcast %cst_9 : f32 to vector<16x128xf32>
    %14 = arith.mulf %13, %12 : vector<16x128xf32>
    %15 = math.tanh %14 : vector<16x128xf32>
    %cst_10 = arith.constant 5.000000e-01 : f32
    %16 = vector.broadcast %cst_10 : f32 to vector<16x128xf32>
    %17 = arith.mulf %16, %15 : vector<16x128xf32>
    %cst_11 = arith.constant 5.000000e-01 : f32
    %18 = vector.broadcast %cst_11 : f32 to vector<16x128xf32>
    %19 = arith.addf %17, %18 : vector<16x128xf32>
    %20 = arith.mulf %12, %19 : vector<16x128xf32>
    %cst_12 = arith.constant 0.707106769 : f32
    %21 = vector.broadcast %cst_12 : f32 to vector<16x128xf32>
    %22 = arith.mulf %0, %21 : vector<16x128xf32>
    %cst_13 = arith.constant 1.17851126 : f32
    %23 = vector.broadcast %cst_13 : f32 to vector<16x128xf32>
    %24 = arith.mulf %20, %23 : vector<16x128xf32>
    %25 = arith.addf %22, %24 : vector<16x128xf32>
    %c0_14 = arith.constant 0 : index
    %c0_15 = arith.constant 0 : index
    %26 = vector.load %arg4[%c0_14, %c0_15] : memref<16x128xf32, #tpu.memory_space<vmem>>, vector<16x128xf32>
    tpu.vector_store %arg4[%c0_14, %c0_15], %25 {strides = array<i32>} : memref<16x128xf32, #tpu.memory_space<vmem>>, vector<16x128xf32>,
    return
  }
  func.func @transform_0(%arg0: i32) -> (i32, i32) {
    %c0_i32 = arith.constant 0 : i32
    %c0_i32_0 = arith.constant 0 : i32
    return %arg0, %c0_i32 : i32, i32
  }
  func.func @transform_1(%arg0: i32) -> (i32, i32) {
    %c0_i32 = arith.constant 0 : i32
    %c0_i32_0 = arith.constant 0 : i32
    %c0_i32_1 = arith.constant 0 : i32
    return %c0_i32, %c0_i32_0 : i32, i32
  }
  func.func @transform_2(%arg0: i32) -> (i32, i32) {
    %c0_i32 = arith.constant 0 : i32
    %c0_i32_0 = arith.constant 0 : i32
    %c0_i32_1 = arith.constant 0 : i32
    return %c0_i32, %c0_i32_0 : i32, i32
  }
  func.func @transform_3(%arg0: i32) -> (i32, i32) {
    %c0_i32 = arith.constant 0 : i32
    %c0_i32_0 = arith.constant 0 : i32
    return %arg0, %c0_i32 : i32, i32
  }
}

</mosaic_0001>

<bundles_post_ra>
// kernel: tpu_custom_call.1
= control target key start
LH: loop header
LB: loop body
LE: loop exit
PB: predicated region body
PF: predicated region fallthrough
CT: control target
= control target key end

     0   :  { %6 = vsyncpa [#allocation3], 0  ;;  %s482_s0 = inlined_call_operand.hbm [shape: f32[8,128], index: 0, kind: input, shape index: {}]   ;;  %s483_s1 = inlined_call_operand.hbm [shape: f32[16,128], index: 1, kind: output, shape index: {}]  }
   0x1   :  { %7 = vsyncpa [#allocation4], 0 }
   0x2   :  { %9 = vsyncpa [#allocation4 + $0x1], 0  ;;  %s352_s6 = smov 0   ;;  %s354_s7 = smov 0  }
   0x3   :  { %s356_s8 = smov 0   ;;  %s358_s9 = smov 0  }
   0x4 LB: > { %s373_s10 = sadd.s32 4294967295, %s338_s9   ;;  %s184_s11 = sadd.s32 4294967294, %s338_s9   ;;  %s338_s9 = sphi %s358_s9, %s499_s9   ;;  %s334_s8 = sphi %s356_s8, %s498_s8   ;;  %s330_s7 = sphi %s354_s7, %s497_s7   ;;  %s326_s6 = sphi %s352_s6, %s496_s6  }
   0x5   : > { %s377_s12 = sadd.s32 1, %s338_s9   ;;  %s43_s13 = sadd.s32 1, %s334_s8 }
   0x6   : > { %s40_s14 = ssub.s32 %s338_s9, %s377_s12  ;;  %p53_p0 = scmp.ne.s32.totalorder %s334_s8, %s330_s7 }
   0x7   : > { %p41_p1 = scmp.eq.s32.totalorder %s40_s14, 0  ;;  %p54_p2 = scmp.eq.s32.totalorder %s373_s10, 1 }
   0x8   : > { %p59_p3 = scmp.ne.s32.totalorder %s330_s7, %s326_s6  ;;  %p60_p4 = scmp.eq.s32.totalorder %s184_s11, 1 }
   0x9   : > { %s388_s15 = scalar_select %p41_p1, %s334_s8, %s43_s13  }
   0xa   : > { %p390_p5 = por %p54_p2, %p53_p0  ;;  %p394_p6 = por %p60_p4, %p59_p3 }
   0xb   : > { %p185_p7 = scmp.ge.s32.totalorder %s338_s9, 1  ;;  %p67_p8 = scmp.lt.s32.totalorder %s338_s9, 3 }
   0xc   : > { %s487_s16 = scalar_select %p390_p5, 1, 0 }
   0xd   : > { %s488_s17 = scalar_select %p394_p6, 1, 0 }
   0xe   : > { %p484_p9 = scmp.eq.s32.totalorder %s373_s10, 0  ;;  %p401_p10 = pnand %p185_p7, %p67_p8 }
   0xf   : > { %s340_s19 = smov [#allocation2]   ;;  %s244_s24 = scalar_lea.hbm %s482_s0, 128 }
  0x10   : > { %s489_s18 = scalar_select %p401_p10, 1, 0 }
  0x11   : > { %s80_s20 = sshll.u32 %s340_s19, 4  ;;  %p200_p11 = pneg %p401_p10  ;;  %s81_s20 = int_to_ptr.vmem [resolvable:$true] %s80_s20 }
  0x12   : > { %p245_p13 = scmp.ne.s32.totalorder %s482_s0, %s244_s24  ;;  %p251_p3 = scmp.lt.u32.totalorder %s244_s24, %s482_s0 }
  0x13   : > { %p409_p12 = pnand %p484_p9, %p200_p11 }
  0x15   : > { %p246_p0 = pneg %p409_p12 }
  0x17   : > { %p247_p1 = pnand %p246_p0, %p245_p13 }
  0x19   : > { %p248_p2 = pneg %p247_p1 }
  0x1b   : > { %p253_p4 = pnand %p251_p3, %p248_p2 }
  0x1d   : > { %256 = shalt.err (!%p253_p4)
}
  0x1e   : > { %s257_s29 = scalar_lea.vmem %s81_s20, 128  ;;  %p265_p9 = scmp.lt.s32.totalorder %s81_s20, %s81_s20 }
  0x1f   : > { %p258_p7 = scmp.ne.s32.totalorder %s81_s20, %s257_s29  ;;  %p266_p6 = scmp.lt.s32.totalorder %s257_s29, %s257_s29 }
  0x21   : > { %p260_p8 = pnand %p258_p7, %p246_p0  ;;  %p267_p5 = por %p266_p6, %p265_p9 }
  0x23   : > { %p261_p11 = pneg %p260_p8 }
  0x25   : > { %p268_p10 = pnand %p267_p5, %p261_p11 }
  0x27   : > { %271 = shalt.err (!%p268_p10)
}
  0x28   : > { %203 = dma.hbm_to_vmem [thread:$0]  (!%p409_p12), %s482_s0, 128, %s81_s20, [#allocation3]  }
  0x29   : > { %p491_p13 = scmp.ne.s32.totalorder %s489_s18, 0 }
  0x2a   : > { %p492_p1 = scmp.eq.s32.totalorder (!%p491_p13), %s373_s10, 0 }
  0x2b   : > { %93 = sbr.rel (%p491_p13) target bundleno = 77 (0x4d), region = 24 }
  0x32   : > { %317 = dma.done.wait (%p492_p1), [#allocation3], 128   ;;  %p493_p0 = pmov %p492_p1 }
  0x33   : > { %s105_s3 = sand.u32 1, %s330_s7   ;;  %s191_s13 = sshll.u32 %s373_s10, 7  ;;  %v108_v0 = vld [vmem:[#allocation2] sm:$0xff] }
  0x34   : > { %319 = vsyncadd (%p493_p0), [#allocation3], 4294967168  ;;  %s189_s4 = sshll.u32 %s105_s3, 3  ;;  %v109_v1 = vadd.f32 1.0, %v108_v0  ;;  %s442_s19 = scalar_lea.hbm %s483_s1, %s191_s13 }
  0x35   : > { %s107_s5 = scalar_lea.vmem [#allocation5], %s189_s4  ;;  %s112_s20 = scalar_lea.sflag [#allocation4], %s105_s3 }
  0x36   : > { %s125_s11 = sshll.u32 %s107_s5, 4  ;;  %110 = vst [vmem:[%s107_s5] sm:$0xff] %v109_v1  ;;  %p494_p6 = scmp.ne.s32.totalorder %s487_s16, 0  ;;  %s437_s11 = int_to_ptr.vmem [resolvable:$true] %s125_s11 }
  0x37   : > { %s272_s21 = scalar_lea.vmem %s437_s11, 128  ;;  %s341_s10 = smov [#allocation5]  }
  0x38   : > { %p273_p5 = scmp.ne.s32.totalorder %s437_s11, %s272_s21  ;;  %s276_s22 = sshll.u32 %s341_s10, 4  ;;  %s277_s22 = int_to_ptr.vmem [resolvable:$false] %s276_s22 }
  0x39   : > { %s278_s23 = scalar_lea.vmem %s277_s22, 256  ;;  %p279_p12 = scmp.lt.s32.totalorder %s437_s11, %s277_s22 }
  0x3a   : > { %p274_p9 = pnand %p273_p5, %p494_p6  ;;  %p280_p2 = scmp.lt.s32.totalorder %s278_s23, %s272_s21 }
  0x3c   : > { %p275_p10 = pneg %p274_p9  ;;  %p281_p3 = por %p280_p2, %p279_p12 }
  0x3e   : > { %p282_p4 = pnand %p281_p3, %p275_p10 }
  0x40   : > { %285 = shalt.err (!%p282_p4)
}
  0x41   : > { %s286_s24 = scalar_lea.hbm %s442_s19, 128  ;;  %s290_s27 = scalar_lea.hbm %s483_s1, 256 }
  0x42   : > { %p287_p7 = scmp.ne.s32.totalorder %s442_s19, %s286_s24  ;;  %p291_p13 = scmp.lt.u32.totalorder %s442_s19, %s483_s1 }
  0x43   : > { %p292_p1 = scmp.lt.u32.totalorder %s290_s27, %s286_s24  ;;  %p294_p5 = scmp.lt.u32.totalorder %s286_s24, %s442_s19 }
  0x44   : > { %p288_p8 = pnand %p287_p7, %p494_p6 }
  0x45   : > { %p293_p0 = por %p292_p1, %p291_p13 }
  0x46   : > { %p289_p11 = pneg %p288_p8 }
  0x47   : > { %p295_p9 = por %p294_p5, %p293_p0 }
  0x49   : > { %p296_p10 = pnand %p295_p9, %p289_p11 }
  0x4b   : > { %299 = shalt.err (!%p296_p10)
}
  0x4c   : > { %198 = dma.vmem_to_hbm [thread:$0]  (%p494_p6), %s437_s11, 128, %s442_s19, %s112_s20  }
  0x4d PF: > { %p210_p12 = scmp.ge.s32.totalorder %s338_s9, 2  ;;  %s137_s30 = sand.u32 1, %s326_s6  }
  0x4e   : > { %p495_p2 = scmp.ne.s32.totalorder %s488_s17, 0  ;;  %s138_s2 = scalar_lea.sflag [#allocation4], %s137_s30 }
  0x50   : > { %p205_p3 = pnand %p210_p12, %p495_p2 }
  0x52   : > { %321 = dma.done.wait (!%p205_p3), %s138_s2, 128  }
  0x53   : > { %323 = vsyncadd (!%p205_p3), %s138_s2, 4294967168  ;;  %p12_p4 = scmp.ge.s32.totalorder %s377_s12, 4   ;;  %s496_s6 = smov %s330_s7 }
  0x54   : > { %s497_s7 = smov %s334_s8  ;;  %s498_s8 = smov %s388_s15 }
  0x55   : > { %s499_s9 = smov %s377_s12  ;;  %14 = sbr.rel (!%p12_p4) target bundleno = 4 (0x4), region = 61 }
  0x5c   :  { %143 = vsyncpa [#allocation3], 1 }
  0x5d   :  { %145 = vsyncpa [#allocation3 + $0x1], 1 }
  0x5e   :  { %146 = vsyncpa [#allocation4], 1 }
  0x5f   :  { %148 = vsyncpa [#allocation4 + $0x1], 1 }

// kernel: tpu_custom_call.1
= control target key start
LH: loop header
LB: loop body
LE: loop exit
PB: predicated region body
PF: predicated region fallthrough
CT: control target
= control target key end

     0   :  { %8 = vsyncpa [#allocation3], 0  ;;  %s661_s0 = inlined_call_operand.hbm [shape: f32[16,128], index: 0, kind: input, shape index: {}]   ;;  %s662_s1 = inlined_call_operand.hbm [shape: f32[128,128], index: 1, kind: input, shape index: {}]   ;;  %s663_s2 = inlined_call_operand.hbm [shape: f32[128,128], index: 2, kind: input, shape index: {}]   ;;  %s664_s3 = inlined_call_operand.hbm [shape: f32[16,128], index: 3, kind: output, shape index: {}]  }
   0x1   :  { %9 = vsyncpa [#allocation6], 0 }
   0x2   :  { %10 = vsyncpa [#allocation4], 0  ;;  %s564_s12 = smov [#allocation5]   ;;  %s565_s14 = smov [#allocation2]  }
   0x3   :  { %s28_s13 = sshll.u32 %s564_s12, 4  ;;  %s16_s15 = sshll.u32 %s565_s14, 4  ;;  %s29_s13 = int_to_ptr.vmem [resolvable:$true] %s28_s13  ;;  %s590_s15 = int_to_ptr.vmem [resolvable:$true] %s16_s15 }
   0x4   :  { %s470_s18 = scalar_lea.hbm %s662_s1, 2048 }
   0x5   :  { %p471_p0 = scmp.ne.s32.totalorder %s662_s1, %s470_s18  ;;  %p474_p1 = scmp.lt.u32.totalorder %s470_s18, %s662_s1 }
   0x7   :  { %p476_p2 = pnand %p474_p1, %p471_p0 }
   0x9   :  { %479 = shalt.err (!%p476_p2)
}
   0xa   :  { %s480_s23 = scalar_lea.vmem %s29_s13, 2048  ;;  %p485_p4 = scmp.lt.s32.totalorder %s29_s13, %s29_s13 }
   0xb   :  { %p481_p3 = scmp.ne.s32.totalorder %s29_s13, %s480_s23  ;;  %p486_p5 = scmp.lt.s32.totalorder %s480_s23, %s480_s23 }
   0xd   :  { %p487_p6 = por %p486_p5, %p485_p4 }
   0xf   :  { %p488_p7 = pnand %p487_p6, %p481_p3 }
  0x11   :  { %491 = shalt.err (!%p488_p7)
}
  0x12   :  { %s566_s24 = smov 128   ;;  %s567_s25 = smov 8  }
  0x13   :  { %34 = dma.hbm_to_vmem [thread:$0]  %s662_s1, 2048, %s29_s13, [#allocation6], %s566_s24, %s566_s24, %s567_s25  }
  0x14   :  { %s492_s30 = scalar_lea.hbm %s661_s0, 256 }
  0x15   :  { %p493_p8 = scmp.ne.s32.totalorder %s661_s0, %s492_s30  ;;  %p496_p9 = scmp.lt.u32.totalorder %s492_s30, %s661_s0 }
  0x17   :  { %p498_p10 = pnand %p496_p9, %p493_p8 }
  0x19   :  { %501 = shalt.err (!%p498_p10)
}
  0x1a   :  { %s502_s8 = scalar_lea.vmem %s590_s15, 256  ;;  %p507_p12 = scmp.lt.s32.totalorder %s590_s15, %s590_s15 }
  0x1b   :  { %p503_p11 = scmp.ne.s32.totalorder %s590_s15, %s502_s8  ;;  %p508_p13 = scmp.lt.s32.totalorder %s502_s8, %s502_s8 }
  0x1d   :  { %p509_p0 = por %p508_p13, %p507_p12 }
  0x1f   :  { %p510_p1 = pnand %p509_p0, %p503_p11 }
  0x21   :  { %513 = shalt.err (!%p510_p1)
}
  0x22   :  { %22 = dma.hbm_to_vmem [thread:$0]  %s661_s0, 256, %s590_s15, [#allocation3], %s566_s24, %s566_s24, %s567_s25  }
  0x23   :  { %s568_s10 = smov [#allocation7]   ;;  %s514_s14 = scalar_lea.hbm %s663_s2, 2048 }
  0x24   :  { %s40_s11 = sshll.u32 %s568_s10, 4  ;;  %p515_p2 = scmp.ne.s32.totalorder %s663_s2, %s514_s14  ;;  %s41_s11 = int_to_ptr.vmem [resolvable:$true] %s40_s11 }
  0x25   :  { %p518_p3 = scmp.lt.u32.totalorder %s514_s14, %s663_s2 }
  0x27   :  { %p520_p4 = pnand %p518_p3, %p515_p2 }
  0x29   :  { %523 = shalt.err (!%p520_p4)
}
  0x2a   :  { %s524_s20 = scalar_lea.vmem %s41_s11, 2048  ;;  %p529_p6 = scmp.lt.s32.totalorder %s41_s11, %s41_s11 }
  0x2b   :  { %p525_p5 = scmp.ne.s32.totalorder %s41_s11, %s524_s20  ;;  %p530_p7 = scmp.lt.s32.totalorder %s524_s20, %s524_s20 }
  0x2d   :  { %p531_p8 = por %p530_p7, %p529_p6 }
  0x2f   :  { %p532_p9 = pnand %p531_p8, %p525_p5 }
  0x31   :  { %535 = shalt.err (!%p532_p9)
}
  0x32   :  { %46 = dma.hbm_to_vmem [thread:$0]  %s663_s2, 2048, %s41_s11, [#allocation6], %s566_s24, %s566_s24, %s567_s25  }
  0x33   :  { %558 = dma.done.wait [#allocation3], 256  }
  0x34   :  { %559 = vsyncadd [#allocation3], 4294967040 }
  0x35   :  { %560 = dma.done.wait [#allocation6], 4096  }
  0x36   :  { %561 = vsyncadd [#allocation6], 4294963200  ;;  %v58_v0 = vld [vmem:[#allocation5] sm:$0xff]  ;;  %v59_v1 = vld [vmem:[#allocation5 + $0x8] sm:$0xff]  ;;  %s569_s2 = smov [#allocation8]  }
  0x37   :  { %v60_v2 = vld [vmem:[#allocation5 + $0x10] sm:$0xff]  ;;  %v392_v3 = vpack.c.bf16 %v59_v1, %v58_v0  ;;  %v61_v4 = vld [vmem:[#allocation5 + $0x18] sm:$0xff]  ;;  %v62_v6 = vld [vmem:[#allocation5 + $0x20] sm:$0xff]  ;;  %s273_s21 = sshll.u32 %s569_s2, 4  ;;  %s274_s21 = int_to_ptr.vmem [resolvable:$true] %s273_s21 }
  0x38   :  { %v396_v5 = vpack.c.bf16 %v61_v4, %v60_v2  ;;  %v63_v7 = vld [vmem:[#allocation5 + $0x28] sm:$0xff]  ;;  %v64_v9 = vld [vmem:[#allocation5 + $0x30] sm:$0xff]  ;;  %v65_v11 = vld [vmem:[#allocation5 + $0x38] sm:$0xff]  ;;  %s536_s22 = scalar_lea.vmem %s274_s21, 256  ;;  %p541_p11 = scmp.lt.s32.totalorder %s274_s21, %s274_s21 }
  0x39   :  { %393 = vmatprep.subr.bf16.mxu0 %v392_v3  ;;  %v400_v8 = vpack.c.bf16 %v63_v7, %v62_v6  ;;  %v642_v10 = vld [vmem:[#allocation2] sm:$0xff]  ;;  %v159_v12 = vld [vmem:[#allocation7] sm:$0xff]  ;;  %v160_v13 = vld [vmem:[#allocation7 + $0x8] sm:$0xff]  ;;  %v404_v20 = vpack.c.bf16 %v65_v11, %v64_v9  ;;  %p537_p10 = scmp.ne.s32.totalorder %s274_s21, %s536_s22  ;;  %p542_p12 = scmp.lt.s32.totalorder %s536_s22, %s536_s22 }
  0x3a   :  { %395 = vmatpush3.bf16.msra.mxu0 %v392_v3  ;;  %354 = vmatprep.mubr.f32.mxu0 %v642_v10  ;;  %v424_v14 = vpack.c.bf16 %v160_v13, %v159_v12  ;;  %v161_v15 = vld [vmem:[#allocation7 + $0x10] sm:$0xff]  ;;  %v162_v16 = vld [vmem:[#allocation7 + $0x18] sm:$0xff]  ;;  %v163_v18 = vld [vmem:[#allocation7 + $0x20] sm:$0xff]  ;;  %v260_v11 = vmul.f32 0.70710677, %v642_v10 }
  0x3b   :  { %397 = vmatprep.subr.bf16.mxu0 %v396_v5  ;;  %v428_v17 = vpack.c.bf16 %v162_v16, %v161_v15  ;;  %v164_v19 = vld [vmem:[#allocation7 + $0x28] sm:$0xff]  ;;  %v66_v21 = vld [vmem:[#allocation5 + $0x40] sm:$0xff]  ;;  %v68_v25 = vld [vmem:[#allocation5 + $0x50] sm:$0xff]  ;;  %p543_p13 = por %p542_p12, %p541_p11 }
  0x3c   :  { %425 = vmatprep.subr.bf16.mxu1 %v424_v14  ;;  %v67_v22 = vld [vmem:[#allocation5 + $0x48] sm:$0xff]  ;;  %v432_v23 = vpack.c.bf16 %v164_v19, %v163_v18  ;;  %v69_v26 = vld [vmem:[#allocation5 + $0x58] sm:$0xff]  ;;  %v70_v28 = vld [vmem:[#allocation5 + $0x60] sm:$0xff] }
  0x3d   :  { %427 = vmatpush3.bf16.msra.mxu1 %v424_v14  ;;  %v408_v24 = vpack.c.bf16 %v67_v22, %v66_v21  ;;  %v412_v27 = vpack.c.bf16 %v69_v26, %v68_v25  ;;  %v71_v29 = vld [vmem:[#allocation5 + $0x68] sm:$0xff]  ;;  %v72_v31 = vld [vmem:[#allocation5 + $0x70] sm:$0xff]  ;;  %v73_v32 = vld [vmem:[#allocation5 + $0x78] sm:$0xff]  ;;  %p544_p0 = pnand %p543_p13, %p537_p10 }
  0x3e   :  { %399 = vmatpush3.bf16.msra.mxu0 %v396_v5  ;;  %429 = vmatprep.subr.bf16.mxu1 %v428_v17  ;;  %v416_v30 = vpack.c.bf16 %v71_v29, %v70_v28  ;;  %v420_v33 = vpack.c.bf16 %v73_v32, %v72_v31  ;;  %v57_v34 = vld [vmem:[#allocation2 + $0x8] sm:$0xff]  ;;  %v165_v35 = vld [vmem:[#allocation7 + $0x30] sm:$0xff]  ;;  %v167_v38 = vld [vmem:[#allocation7 + $0x40] sm:$0xff] }
  0x3f   :  { %401 = vmatprep.subr.bf16.mxu0 %v400_v8  ;;  %v166_v36 = vld [vmem:[#allocation7 + $0x38] sm:$0xff]  ;;  %v168_v39 = vld [vmem:[#allocation7 + $0x48] sm:$0xff]  ;;  %v169_v41 = vld [vmem:[#allocation7 + $0x50] sm:$0xff] }
  0x40   :  { %v436_v37 = vpack.c.bf16 %v166_v36, %v165_v35  ;;  %v440_v40 = vpack.c.bf16 %v168_v39, %v167_v38  ;;  %v170_v42 = vld [vmem:[#allocation7 + $0x58] sm:$0xff]  ;;  %v171_v44 = vld [vmem:[#allocation7 + $0x60] sm:$0xff]  ;;  %v172_v45 = vld [vmem:[#allocation7 + $0x68] sm:$0xff] }
  0x41   :  { %431 = vmatpush3.bf16.msra.mxu1 %v428_v17  ;;  %v444_v43 = vpack.c.bf16 %v170_v42, %v169_v41  ;;  %v448_v46 = vpack.c.bf16 %v172_v45, %v171_v44  ;;  %v173_v47 = vld [vmem:[#allocation7 + $0x70] sm:$0xff]  ;;  %v174_v48 = vld [vmem:[#allocation7 + $0x78] sm:$0xff] }
  0x42   :  { %403 = vmatpush3.bf16.msra.mxu0 %v400_v8  ;;  %433 = vmatprep.subr.bf16.mxu1 %v432_v23  ;;  %v452_v49 = vpack.c.bf16 %v174_v48, %v173_v47  ;;  %v261_v8 = vmul.f32 0.70710677, %v57_v34 }
  0x43   :  { %405 = vmatprep.subr.bf16.mxu0 %v404_v20 }
  0x45   :  { %435 = vmatpush3.bf16.msra.mxu1 %v432_v23 }
  0x46   :  { %407 = vmatpush3.bf16.msra.mxu0 %v404_v20  ;;  %437 = vmatprep.subr.bf16.mxu1 %v436_v37 }
  0x47   :  { %409 = vmatprep.subr.bf16.mxu0 %v408_v24 }
  0x49   :  { %439 = vmatpush3.bf16.msra.mxu1 %v436_v37 }
  0x4a   :  { %411 = vmatpush3.bf16.msra.mxu0 %v408_v24  ;;  %441 = vmatprep.subr.bf16.mxu1 %v440_v40 }
  0x4b   :  { %413 = vmatprep.subr.bf16.mxu0 %v412_v27 }
  0x4d   :  { %443 = vmatpush3.bf16.msra.mxu1 %v440_v40 }
  0x4e   :  { %415 = vmatpush3.bf16.msra.mxu0 %v412_v27  ;;  %445 = vmatprep.subr.bf16.mxu1 %v444_v43 }
  0x4f   :  { %417 = vmatprep.subr.bf16.mxu0 %v416_v30 }
  0x51   :  { %447 = vmatpush3.bf16.msra.mxu1 %v444_v43 }
  0x52   :  { %419 = vmatpush3.bf16.msra.mxu0 %v416_v30  ;;  %449 = vmatprep.subr.bf16.mxu1 %v448_v46 }
  0x53   :  { %421 = vmatprep.subr.bf16.mxu0 %v420_v33 }
  0x55   :  { %451 = vmatpush3.bf16.msra.mxu1 %v448_v46 }
  0x56   :  { %423 = vmatpush3.bf16.msra.mxu0 %v420_v33  ;;  %453 = vmatprep.subr.bf16.mxu1 %v452_v49 }
  0x59   :  { %355 = vmatmul.mubr.f32.vlgmr.msra.gmra.mrb[0].mxu0 %v57_v34  ;;  %455 = vmatpush3.bf16.msra.mxu1 %v452_v49 }
 0x12c   :  { %v356_v50 = vpop.f32.mrb[0].mxu0 }
 0x12d   :  { %v150_v51 = vmul.f32 0.5, %v356_v50  ;;  %v140_v52 = vpop.f32.mrb[1].mxu0 }
 0x12e   :  { %v149_v53 = vmul.f32 0.5, %v140_v52 }
 0x12f   :  { %462 = vtanh.f32 %v150_v51 }
 0x130   :  { %464 = vtanh.f32 %v149_v53 }
 0x139   :  { %v463_v54 = vpop.eup %462 }
 0x13a   :  { %v465_v55 = vpop.eup %464  ;;  %v154_v56 = vmul.f32 0.5, %v463_v54 }
 0x13b   :  { %v153_v57 = vmul.f32 0.5, %v465_v55 }
 0x13c   :  { %v156_v58 = vadd.f32 0.5, %v154_v56 }
 0x13d   :  { %v155_v59 = vadd.f32 0.5, %v153_v57 }
 0x13e   :  { %v158_v61 = vmul.f32 %v356_v50, %v156_v58 }
 0x13f   :  { %v157_v60 = vmul.f32 %v155_v59, %v140_v52 }
 0x141   :  { %389 = vmatprep.mubr.f32.mxu1 %v157_v60 }
 0x142   :  { %390 = vmatmul.mubr.f32.vlgmr.msra.gmra.mrb[0].mxu1 %v158_v61 }
 0x215   :  { %v391_v62 = vpop.f32.mrb[0].mxu1 }
 0x216   :  { %v251_v63 = vmul.f32 0.5, %v391_v62  ;;  %v241_v0 = vpop.f32.mrb[1].mxu1 }
 0x217   :  { %v250_v1 = vmul.f32 0.5, %v241_v0 }
 0x218   :  { %466 = vtanh.f32 %v251_v63 }
 0x219   :  { %468 = vtanh.f32 %v250_v1 }
 0x222   :  { %v467_v2 = vpop.eup %466 }
 0x223   :  { %v469_v3 = vpop.eup %468  ;;  %v255_v4 = vmul.f32 0.5, %v467_v2 }
 0x224   :  { %v254_v5 = vmul.f32 0.5, %v469_v3 }
 0x225   :  { %v257_v6 = vadd.f32 0.5, %v255_v4 }
 0x226   :  { %v256_v7 = vadd.f32 0.5, %v254_v5 }
 0x227   :  { %v259_v9 = vmul.f32 %v391_v62, %v257_v6 }
 0x228   :  { %v258_v12 = vmul.f32 %v256_v7, %v241_v0 }
 0x229   :  { %v263_v13 = vmul.f32 1.1785113, %v259_v9 }
 0x22a   :  { %v262_v14 = vmul.f32 1.1785113, %v258_v12 }
 0x22b   :  { %v265_v15 = vadd.f32 %v263_v13, %v261_v8 }
 0x22c   :  { %v264_v16 = vadd.f32 %v262_v14, %v260_v11 }
 0x22d   :  { %267 = vst [vmem:[#allocation8 + $0x8] sm:$0xff] %v265_v15 }
 0x22e   :  { %266 = vst [vmem:[#allocation8] sm:$0xff] %v264_v16 }
 0x22f   :  { %547 = shalt.err (!%p544_p0)
}
 0x230   :  { %s548_s27 = scalar_lea.hbm %s664_s3, 256 }
 0x231   :  { %p549_p1 = scmp.ne.s32.totalorder %s664_s3, %s548_s27  ;;  %p552_p2 = scmp.lt.u32.totalorder %s548_s27, %s664_s3 }
 0x233   :  { %p554_p3 = pnand %p552_p2, %p549_p1 }
 0x235   :  { %557 = shalt.err (!%p554_p3)
}
 0x236   :  { %279 = dma.vmem_to_hbm [thread:$0]  %s274_s21, 256, %s664_s3, [#allocation4], %s566_s24, %s566_s24, %s567_s25  }
 0x237   :  { %562 = dma.done.wait [#allocation4], 256  }
 0x238   :  { %563 = vsyncadd [#allocation4], 4294967040 }
 0x239   :  { %283 = vsyncpa [#allocation3], 1 }
 0x23a   :  { %284 = vsyncpa [#allocation6], 1 }
 0x23b   :  { %285 = vsyncpa [#allocation4], 1 }

</bundles_post_ra>
